<compile_context>
chip_gen: v7x
topology: tpu7x:2x2x1
jax: 0.10.0
libtpu: 0.0.40
codegen_flags: <defaults>
</compile_context>

<pallas_src>
import functools

import numpy as np
import jax
import jax.numpy as jnp
from jax.experimental import pallas as pl
from jax.experimental.pallas import tpu as pltpu


# ----------------------------------------------------------------------------
# In-kernel augmentation math (f32 emulation of PIL uint8 ops).
# x is (Nb, C, HW) float32, pixel values in [0, 255]; HW is the lane axis.
# ----------------------------------------------------------------------------
def _quant(x):
    # uint8 quantization after fractional-valued ops (approx. PIL rounding;
    # exact PIL paths truncate / round-half-up -> occasional off-by-one).
    return jnp.clip(jnp.floor(x + 0.5), 0.0, 255.0)


def _grayscale(x):
    # PIL 'L': (R*19595 + G*38470 + B*7471 + 0x8000) >> 16.  All intermediates
    # stay < 2**24 so this is exact in f32 with one scale by 2**-16.
    r = x[:, 0:1, :]
    g = x[:, 1:2, :]
    b = x[:, 2:3, :]
    return jnp.floor(
        (r * 19595.0 + g * 38470.0 + b * 7471.0 + 32768.0) * (1.0 / 65536.0))


def _blend(degenerate, image, factor):
    # PIL ImageEnhance: Image.blend(degenerate, image, factor); broadcasts.
    return _quant(degenerate + factor * (image - degenerate))


def _apply_op(name, p, x):
    """p is a traced f32 scalar read from SMEM (ignored by autocontrast)."""
    if name == "autocontrast":
        lo = jnp.min(x, axis=-1, keepdims=True)     # per image, per channel
        hi = jnp.max(x, axis=-1, keepdims=True)
        scale = 255.0 / jnp.maximum(hi - lo, 1.0)
        stretched = jnp.clip(jnp.floor((x - lo) * scale), 0.0, 255.0)
        return jnp.where(hi > lo, stretched, x)
    if name == "solarize":                          # p = threshold
        return jnp.where(x < p, x, 255.0 - x)
    if name == "posterize":                         # p = 2 ** (8 - bits), power of 2
        return jnp.floor(x * (1.0 / p)) * p
    if name == "color":                             # p = enhance factor
        return _blend(_grayscale(x), x, p)
    if name == "contrast":                          # p = enhance factor
        gray = _grayscale(x)                        # (Nb, 1, HW)
        mean = jnp.floor(jnp.mean(gray, axis=-1, keepdims=True) + 0.5)
        return _blend(mean, x, p)
    if name == "brightness":                        # p = enhance factor
        return _blend(0.0, x, p)
    raise NotImplementedError(name)


def _build_kernel(op_names):
    """op_names is a static tuple; parameters come in at runtime via SMEM."""

    def kernel(params_ref, x_ref, o_ref):
        x = x_ref[...].astype(jnp.float32)          # bf16 HBM block -> f32 math
        for i, name in enumerate(op_names):
            x = _apply_op(name, params_ref[i], x)
        o_ref[...] = x.astype(o_ref.dtype)          # already integer in [0, 255]

    return kernel


# ----------------------------------------------------------------------------
# pallas_call wrapper (traced under jit; op_names / nb are static).
# ----------------------------------------------------------------------------
def _randaugment_call(op_names, nb, params, img):
    N, C, H, W = img.shape
    HW = H * W
    x = img.reshape(N, C, HW).astype(jnp.bfloat16)  # lane-dense layout

    block = (nb, C, HW)                             # last two dims = full dims
    img_spec = pl.BlockSpec(block, lambda n: (n, 0, 0))
    smem_spec = pl.BlockSpec(memory_space=pltpu.MemorySpace.SMEM)

    # VMEM: double-buffered bf16 in+out blocks + f32 working set in the body.
    block_bytes = nb * C * HW * 2
    vmem_est = 4 * block_bytes + 4 * nb * C * HW * 4
    cp = {"dimension_semantics": ("parallel",)}
    if vmem_est > 16 * 1024 * 1024:                 # beyond v5e default scoped VMEM
        cp["vmem_limit_bytes"] = int(min(vmem_est, 64 * 1024 * 1024))  # v7x cap

    out = pl.pallas_call(
        _build_kernel(op_names),
        out_shape=jax.ShapeDtypeStruct((N, C, HW), jnp.bfloat16),
        grid=(N // nb,),
        in_specs=[smem_spec, img_spec],
        out_specs=img_spec,
        compiler_params=pltpu.CompilerParams(**cp),
    )(params, x)

    return out.reshape(N, C, H, W).astype(img.dtype)


_COMPILED = {}


def _get_compiled(op_names, nb):
    """One compile per (op-name chain, batch block); params stay runtime data."""
    key = (op_names, nb)
    fn = _COMPILED.get(key)
    if fn is None:
        fn = jax.jit(functools.partial(_randaugment_call, op_names, nb))
        _COMPILED[key] = fn
    return fn


def _pick_batch_block(n, bytes_per_image):
    """Images per grid step: ~1 MiB blocks, but keep >= 2 steps when N >= 2."""
    nb = max(1, min(n, (1 << 20) // max(1, bytes_per_image)))
    if n >= 2:
        nb = min(nb, max(1, n // 2))    # >= 2 parallel steps (v7x dual-TC)
    while n % nb:                        # blocks must tile N exactly
        nb -= 1
    return nb


# ----------------------------------------------------------------------------
# Host-side glue: op / severity sampling (composer augmentation_primitives).
# ----------------------------------------------------------------------------
_IMPLEMENTED_AUGS = ("autocontrast", "solarize", "posterize",
                     "color", "contrast", "brightness")


def _int_parameter(level, maxval):
    return int(level * maxval / 10.0)


def _sample_level(rng, n):
    return rng.uniform(0.1, n)


def _symmetric_sample(rng, level):
    # Enhancement factor sampled symmetrically about 1 (identity), spread grows
    # with severity (approximation of composer's _symmetric_sample helper).
    if rng.uniform() < 0.5:
        return rng.uniform(max(0.1, 1.0 - 0.09 * level), 1.0)
    return rng.uniform(1.0, 1.0 + 0.09 * level)


def _sample_param(name, severity, rng):
    """Single f32 scalar per op (fed to the kernel through SMEM)."""
    if name == "autocontrast":
        return 0.0                                      # unused
    if name == "solarize":
        level = _int_parameter(_sample_level(rng, severity), 256)
        return float(256 - level)                       # threshold
    if name == "posterize":
        level = _int_parameter(_sample_level(rng, severity), 4)
        bits = max(4 - level, 0)
        return float(2 ** (8 - bits))                   # quantum
    return float(_symmetric_sample(rng, severity))      # color/contrast/brightness


class RandAugmentTransformPallas:
    """Pallas-backed equivalent of composer's RandAugmentTransform.forward."""

    def __init__(self, severity: int = 9, depth: int = 2, seed: int = 0):
        if severity < 0 or severity > 10:
            raise ValueError("RandAugment severity value must satisfy 0 <= severity <= 10")
        if depth < 0:
            raise ValueError("RandAugment depth value must be >= 0")
        self.severity = severity
        self.depth = depth
        self._rng = np.random.default_rng(seed)         # deterministic host RNG

    def __call__(self, img):
        # img: (N, 3, H, W) bf16 (preferred HBM storage) or any float dtype,
        #      holding uint8 pixel values in [0, 255].
        if self.depth == 0:
            return img
        N, C, H, W = img.shape
        if C != 3:
            raise ValueError("RandAugment expects RGB images (C == 3)")

        names, params = [], []
        for _ in range(self.depth):
            name = str(self._rng.choice(_IMPLEMENTED_AUGS))
            names.append(name)
            params.append(_sample_param(name, self.severity, self._rng))

        nb = _pick_batch_block(N, C * H * W * 2)        # bf16 bytes per image
        fn = _get_compiled(tuple(names), nb)            # cached per op chain
        return fn(jnp.asarray(params, dtype=jnp.float32), img)


# ----------------------------------------------------------------------------
if __name__ == "__main__":
    key = jax.random.PRNGKey(0)
    N, C, H, W = 2, 3, 16, 16        # NCHW, uint8-valued pixels stored as bf16
    img = jax.random.randint(key, (N, C, H, W), 0, 256).astype(jnp.bfloat16)

    transform = RandAugmentTransformPallas(severity=9, depth=2, seed=0)
    out = jax.block_until_ready(transform(img))
    assert out.shape == img.shape and out.dtype == img.dtype
    o32 = out.astype(jnp.float32)
    assert bool(jnp.all(o32 >= 0.0)) and bool(jnp.all(o32 <= 255.0))
    assert bool(jnp.all(o32 == jnp.round(o32)))         # output stays uint8-valued

    # Second call samples a (possibly) different chain -> exercises the cache.
    out2 = jax.block_until_ready(transform(img))
    assert out2.shape == img.shape and out2.dtype == img.dtype

    # Exercise every implemented op in one fused chain with fixed params.
    all_ops = ("autocontrast", "solarize", "posterize",
               "color", "contrast", "brightness")
    all_params = jnp.asarray([0.0, 128.0, 64.0, 1.3, 0.7, 1.2], dtype=jnp.float32)
    out3 = jax.block_until_ready(_get_compiled(all_ops, 1)(all_params, img))
    o3 = out3.astype(jnp.float32)
    assert out3.shape == img.shape
    assert bool(jnp.all(o3 >= 0.0)) and bool(jnp.all(o3 <= 255.0))

    print("KERNEL_OK")
</pallas_src>

<mosaic_0001>
module attributes {stable_mosaic.version = 11 : i64} {
  func.func @kernel(%arg0: i32, %arg1: memref<2xf32, #tpu.memory_space<smem>>, %arg2: memref<1x3x256xbf16, #tpu.memory_space<vmem>>, %arg3: memref<1x3x256xbf16, #tpu.memory_space<vmem>>) attributes {dimension_semantics = [#tpu.dimension_semantics<parallel>], iteration_bounds = array<i64: 2>, scalar_prefetch = 0 : i64, scratch_operands = 0 : i64, tpu.core_type = #tpu.core_type<tc>, window_params = [{transform_indices = @transform_0, window_bounds = array<i64: 2>}, {transform_indices = @transform_1, window_bounds = array<i64: 1, 3, 256>}, {transform_indices = @transform_2, window_bounds = array<i64: 1, 3, 256>}]} {
    %c0 = arith.constant 0 : index
    %c0_0 = arith.constant 0 : index
    %c0_1 = arith.constant 0 : index
    %0 = vector.load %arg2[%c0, %c0_0, %c0_1] : memref<1x3x256xbf16, #tpu.memory_space<vmem>>, vector<1x3x256xbf16>
    %1 = arith.extf %0 : vector<1x3x256xbf16> to vector<1x3x256xf32>
    %c0_2 = arith.constant 0 : index
    %2 = memref.load %arg1[%c0_2] : memref<2xf32, #tpu.memory_space<smem>>
    %cst = arith.constant 0.000000e+00 : f32
    %3 = vector.broadcast %cst : f32 to vector<1x3x256xf32>
    %4 = arith.subf %1, %3 : vector<1x3x256xf32>
    %5 = vector.broadcast %2 : f32 to vector<1x3x256xf32>
    %6 = arith.mulf %5, %4 : vector<1x3x256xf32>
    %cst_3 = arith.constant 0.000000e+00 : f32
    %7 = vector.broadcast %cst_3 : f32 to vector<1x3x256xf32>
    %8 = arith.addf %7, %6 : vector<1x3x256xf32>
    %cst_4 = arith.constant 5.000000e-01 : f32
    %9 = vector.broadcast %cst_4 : f32 to vector<1x3x256xf32>
    %10 = arith.addf %8, %9 : vector<1x3x256xf32>
    %11 = math.floor %10 : vector<1x3x256xf32>
    %cst_5 = arith.constant 0.000000e+00 : f32
    %cst_6 = arith.constant 2.550000e+02 : f32
    %12 = vector.broadcast %cst_5 : f32 to vector<1x3x256xf32>
    %13 = arith.maximumf %12, %11 : vector<1x3x256xf32>
    %14 = vector.broadcast %cst_6 : f32 to vector<1x3x256xf32>
    %15 = arith.minimumf %14, %13 : vector<1x3x256xf32>
    %c1 = arith.constant 1 : index
    %16 = memref.load %arg1[%c1] : memref<2xf32, #tpu.memory_space<smem>>
    %17 = vector.extract_strided_slice %15 {offsets = [0, 0, 0], sizes = [1, 1, 256], strides = [1, 1, 1]} : vector<1x3x256xf32> to vector<1x1x256xf32>
    %18 = vector.extract_strided_slice %15 {offsets = [0, 1, 0], sizes = [1, 1, 256], strides = [1, 1, 1]} : vector<1x3x256xf32> to vector<1x1x256xf32>
    %19 = vector.extract_strided_slice %15 {offsets = [0, 2, 0], sizes = [1, 1, 256], strides = [1, 1, 1]} : vector<1x3x256xf32> to vector<1x1x256xf32>
    %cst_7 = arith.constant 1.959500e+04 : f32
    %20 = vector.broadcast %cst_7 : f32 to vector<1x1x256xf32>
    %21 = arith.mulf %17, %20 : vector<1x1x256xf32>
    %cst_8 = arith.constant 3.847000e+04 : f32
    %22 = vector.broadcast %cst_8 : f32 to vector<1x1x256xf32>
    %23 = arith.mulf %18, %22 : vector<1x1x256xf32>
    %24 = arith.addf %21, %23 : vector<1x1x256xf32>
    %cst_9 = arith.constant 7.471000e+03 : f32
    %25 = vector.broadcast %cst_9 : f32 to vector<1x1x256xf32>
    %26 = arith.mulf %19, %25 : vector<1x1x256xf32>
    %27 = arith.addf %24, %26 : vector<1x1x256xf32>
    %cst_10 = arith.constant 3.276800e+04 : f32
    %28 = vector.broadcast %cst_10 : f32 to vector<1x1x256xf32>
    %29 = arith.addf %27, %28 : vector<1x1x256xf32>
    %cst_11 = arith.constant 1.52587891E-5 : f32
    %30 = vector.broadcast %cst_11 : f32 to vector<1x1x256xf32>
    %31 = arith.mulf %29, %30 : vector<1x1x256xf32>
    %32 = math.floor %31 : vector<1x1x256xf32>
    %33 = vector.broadcast %32 : vector<1x1x256xf32> to vector<1x3x256xf32>
    %34 = arith.subf %15, %33 : vector<1x3x256xf32>
    %35 = vector.broadcast %16 : f32 to vector<1x3x256xf32>
    %36 = arith.mulf %35, %34 : vector<1x3x256xf32>
    %37 = vector.broadcast %32 : vector<1x1x256xf32> to vector<1x3x256xf32>
    %38 = arith.addf %37, %36 : vector<1x3x256xf32>
    %cst_12 = arith.constant 5.000000e-01 : f32
    %39 = vector.broadcast %cst_12 : f32 to vector<1x3x256xf32>
    %40 = arith.addf %38, %39 : vector<1x3x256xf32>
    %41 = math.floor %40 : vector<1x3x256xf32>
    %cst_13 = arith.constant 0.000000e+00 : f32
    %cst_14 = arith.constant 2.550000e+02 : f32
    %42 = vector.broadcast %cst_13 : f32 to vector<1x3x256xf32>
    %43 = arith.maximumf %42, %41 : vector<1x3x256xf32>
    %44 = vector.broadcast %cst_14 : f32 to vector<1x3x256xf32>
    %45 = arith.minimumf %44, %43 : vector<1x3x256xf32>
    %46 = arith.truncf %45 : vector<1x3x256xf32> to vector<1x3x256xbf16>
    %c0_15 = arith.constant 0 : index
    %c0_16 = arith.constant 0 : index
    %c0_17 = arith.constant 0 : index
    %47 = vector.load %arg3[%c0_15, %c0_16, %c0_17] : memref<1x3x256xbf16, #tpu.memory_space<vmem>>, vector<1x3x256xbf16>
    tpu.vector_store %arg3[%c0_15, %c0_16, %c0_17], %46 {strides = array<i32>} : memref<1x3x256xbf16, #tpu.memory_space<vmem>>, vector<1x3x256xbf16>,
    return
  }
  func.func @transform_0(%arg0: i32) -> i32 {
    %c0_i32 = arith.constant 0 : i32
    %c0_i32_0 = arith.constant 0 : i32
    return %c0_i32 : i32
  }
  func.func @transform_1(%arg0: i32) -> (i32, i32, i32) {
    %c0_i32 = arith.constant 0 : i32
    %c0_i32_0 = arith.constant 0 : i32
    %c0_i32_1 = arith.constant 0 : i32
    return %arg0, %c0_i32, %c0_i32_0 : i32, i32, i32
  }
  func.func @transform_2(%arg0: i32) -> (i32, i32, i32) {
    %c0_i32 = arith.constant 0 : i32
    %c0_i32_0 = arith.constant 0 : i32
    %c0_i32_1 = arith.constant 0 : i32
    return %arg0, %c0_i32, %c0_i32_0 : i32, i32, i32
  }
}

</mosaic_0001>

<bundles_post_ra>
// kernel: _randaugment_call.1
= control target key start
LH: loop header
LB: loop body
LE: loop exit
PB: predicated region body
PF: predicated region fallthrough
CT: control target
= control target key end

     0   :  { %7 = vsyncpa [#allocation3], 0  ;;  %s397_s9 = smov 0   ;;  %s435_s0 = inlined_call_operand.vmem [shape: f32[2], index: 0, kind: input, shape index: {}]   ;;  %s436_s1 = inlined_call_operand.vmem [shape: bf16[2,3,256], index: 1, kind: input, shape index: {}]   ;;  %s437_s2 = inlined_call_operand.vmem [shape: bf16[2,3,256], index: 2, kind: output, shape index: {}]  }
   0x1 LB: > { %s314_s10 = sadd.s32 4294967295, %s378_s9   ;;  %p316_p0 = scmp.ge.s32.totalorder %s378_s9, 1  ;;  %s378_s9 = sphi %s397_s9, %s13_s9  }
   0x2   : > { %p91_p1 = scmp.lt.s32.totalorder %s378_s9, 3  ;;  %s104_s13 = sshll.u32 %s435_s0, 4  ;;  %s105_s13 = int_to_ptr.vmem [resolvable:$true] %s104_s13 }
   0x3   : > { %p341_p3 = scmp.eq.s32.totalorder %s314_s10, 0  ;;  %s353_s15 = scalar_lea.vmem %s105_s13, 16 }
   0x4   : > { %p408_p2 = pnand %p316_p0, %p91_p1  ;;  %p354_p6 = scmp.ne.s32.totalorder %s105_s13, %s353_s15 }
   0x5   : > { %p361_p10 = scmp.lt.s32.totalorder %s105_s13, %s105_s13  ;;  %p362_p11 = scmp.lt.s32.totalorder %s353_s15, %s353_s15 }
   0x6   : > { %p337_p4 = pneg %p408_p2 }
   0x7   : > { %p363_p12 = por %p362_p11, %p361_p10 }
   0x8   : > { %p338_p5 = pnand %p341_p3, %p337_p4 }
   0xa   : > { %p355_p7 = pneg %p338_p5 }
   0xc   : > { %p356_p8 = pnand %p355_p7, %p354_p6 }
   0xe   : > { %p357_p9 = pneg %p356_p8 }
  0x10   : > { %p364_p13 = pnand %p363_p12, %p357_p9 }
  0x12   : > { %367 = shalt.err (!%p364_p13)
}
  0x13   : > { %s380_s16 = smov [#allocation2]   ;;  %125 = sbr.rel (%p408_p2) target bundleno = 89 (0x59), region = 28 }
  0x14   : > { %340 = dma.vmem_to_smem (!%p338_p5), %s105_s13, 16, %s380_s16, [#allocation3]  }
  0x1a   : > { %373 = dma.done.wait (%p341_p3), [#allocation3], 16  }
  0x1b   : > { %375 = vsyncadd (%p341_p3), [#allocation3], 4294967280 }
  0x1c   : > { %131 = sfence }
  0x1d   : > { %p148_p0 = scmp.lt.s32.totalorder %s314_s10, 1  ;;  %s160_s17 = sld [smem:[#allocation2]]  ;;  %v186_v13 = vlaneseq  ;;  %v381_v34 = vmov 1983009808   ;;  %vm237_vm0 = vcmask 1041408   ;;  %vm240_vm2 = vcmask 1043458  }
  0x1e   : > { %s325_s22 = sld [smem:[#allocation2 + $0x1]]  ;;  %v230_v35 = vunpack.c.l.s4 %v381_v34  ;;  %vm238_vm1 = vsmask.f32 1280  ;;  %vm241_vm3 = vsmask.f32 3328 }
  0x1f   : > { %s440_s10 = smov (!%p148_p0, %s314_s10), 1  ;;  %v187_v16 = vshrl.u32 %v186_v13, 7  ;;  %vm239_vm4 = vmand %vm237_vm0, %vm238_vm1 }
  0x20   : > { %s331_s18 = sshll.u32 %s440_s10, 2  ;;  %v231_v40 = vunpack.c.0.s8 %v230_v35  ;;  %vm242_vm5 = vmand %vm240_vm2, %vm241_vm3 }
  0x21   : > { %s152_s21 = scalar_lea.vmem %s436_s1, %s331_s18  ;;  %v188_v19 = vsub.s32 0, %v187_v16  ;;  %v192_v20 = vsub.s32 4, %v187_v16  ;;  %s157_s25 = scalar_lea.vmem %s437_s2, %s331_s18  ;;  %vm243_vm6 = vmor %vm242_vm5, %vm239_vm4 }
  0x22   : > { %v158_v0 = vld [vmem:[%s152_s21] sm:$0xf]  ;;  %v234_v44 = vsub.s32 %v231_v40, %v187_v16 }
  0x23   : > { %v161_v1 = vstv %s160_s17  ;;  %v159_v2 = vunpack.c.l.bf16 %v158_v0  ;;  %v244_v46 = vld [vmem:[%s157_s25] sm:$0xf] }
  0x24   : > { %v209_v27 = vstv %s325_s22 }
  0x25   : > { %v162_v3 = vmul.f32 %v161_v1, %v159_v2 }
  0x27   : > { %v164_v4 = vadd.f32 0.5, %v162_v3 }
  0x29   : > { %v165_v5 = vfloor.f32 %v164_v4 }
  0x2b   : > { %v166_v6 = vmax.f32 %v165_v5, 0.0 }
  0x2d   : > { %v167_v7 = vmin.f32 %v166_v6, 255.0 }
  0x2f   : > { %v169_v8 = vmul.f32 19595.0, %v167_v7  ;;  %v170_v9 = vmul.f32 38470.0, %v167_v7  ;;  %v176_v10 = vmul.f32 7471.0, %v167_v7 }
  0x31   : > { %v326_v11 = vrot.slane %v170_v9, 9  ;;  %v327_v12 = vrot.slane %v176_v10, 10 }
  0x33   : > { %v175_v14 = vadd.f32 %v326_v11, %v169_v8 }
  0x35   : > { %v181_v15 = vadd.f32 %v327_v12, %v175_v14 }
  0x37   : > { %v182_v17 = vadd.f32 32768.0, %v181_v15 }
  0x39   : > { %v183_v18 = vmul.f32 1.5258789e-05, %v182_v17 }
  0x3b   : > { %v184_v21 = vfloor.f32 %v183_v18 }
  0x3d   : > { %v189_v22 = vrot.slane %v184_v21, %v188_v19  ;;  %v193_v23 = vrot.slane %v184_v21, %v192_v20 }
  0x3f   : > { %v199_v24 = vrot.slane %v189_v22, %v188_v19  ;;  %v203_v25 = vrot.slane %v193_v23, %v188_v19 }
  0x41   : > { %v206_v26 = vcombine.low %v199_v24, %v203_v25 }
  0x43   : > { %v208_v28 = vsub.f32 %v167_v7, %v206_v26 }
  0x45   : > { %v210_v29 = vmul.f32 %v209_v27, %v208_v28 }
  0x47   : > { %v212_v30 = vcombine.high %v210_v29, %v210_v29  ;;  %v214_v31 = vadd.f32 %v210_v29, %v199_v24 }
  0x49   : > { %v215_v32 = vadd.f32 %v212_v30, %v203_v25  ;;  %v216_v33 = vadd.f32 0.5, %v214_v31 }
  0x4b   : > { %v217_v36 = vadd.f32 0.5, %v215_v32  ;;  %v218_v37 = vfloor.f32 %v216_v33 }
  0x4d   : > { %v219_v38 = vfloor.f32 %v217_v36  ;;  %v220_v39 = vmax.f32 %v218_v37, 0.0 }
  0x4f   : > { %v221_v41 = vmax.f32 %v219_v38, 0.0  ;;  %v222_v42 = vmin.f32 %v220_v39, 255.0 }
  0x51   : > { %v223_v43 = vmin.f32 %v221_v41, 255.0 }
  0x53   : > { %v328_v45 = vpack.c.bf16 %v223_v43, %v222_v42 }
  0x55   : > { %v235_v47 = vrot.slane %v328_v45, %v234_v44 }
  0x57   : > { %v245_v48 = vsel %vm243_vm6, %v235_v47, %v244_v46 }
  0x58   : > { %246 = vst [vmem:[%s157_s25] sm:$0xf] %v245_v48 }
  0x59 PF: > { %s13_s9 = sadd.s32 1, %s378_s9  }
  0x5a   : > { %p10_p1 = scmp.ge.s32.totalorder %s13_s9, 4  }
  0x5c   :  { %12 = sbr.rel (!%p10_p1) target bundleno = 1 (0x1), region = 63 }
  0x63   :  { %268 = vsyncpa [#allocation3], 1 }
  0x64   :  { %270 = vsyncpa [#allocation3 + $0x1], 1 }

</bundles_post_ra>
